<compile_context>
chip_gen: v7x
topology: tpu7x:2x2x1
jax: 0.10.0
libtpu: 0.0.40
codegen_flags: <defaults>
</compile_context>

<pallas_src>
import functools

import jax
import jax.numpy as jnp
from jax.experimental import pallas as pl
from jax.experimental.pallas import tpu as pltpu

_HALO = 64  # halo half-width in lanes; 2*_HALO = 128 keeps the halo block lane aligned


@functools.lru_cache(maxsize=None)
def _roll_lane_sign():
    """Probe pltpu.roll's lane-rotation convention once.

    Returns +1 if pltpu.roll(x, s, axis)[..., i] == x[..., i - s] (jnp.roll convention),
    -1 if it rotates the opposite way, and 0 if the probe fails (the kernel then falls
    back to plain lane slices, which are always correct).
    """
    try:
        def probe(x_ref, o_ref):
            o_ref[...] = pltpu.roll(x_ref[...], 1, 1)

        x = jnp.broadcast_to(jax.lax.iota(jnp.float32, 128), (8, 128))
        y = pl.pallas_call(probe, out_shape=jax.ShapeDtypeStruct((8, 128), jnp.float32))(x)
        v = int(jax.device_get(y[0, 0]))
        return 1 if v == 127 else (-1 if v == 1 else 0)
    except Exception:  # keep the kernel usable if roll lowering ever changes
        return 0


def _bottleneck_kernel(x_ref, halo_ref, w1_ref, w2_ref, w3_ref, b_ref, o_ref,
                       *, seq_len, mask_tail, roll_sign):
    # Static shapes / constants derived from the refs.
    l_tile = x_ref.shape[2]
    c_mid = w1_ref.shape[0]
    c4 = w3_ref.shape[0]
    k_taps = w2_ref.shape[1] // c_mid
    pad_left = (k_taps - 1) // 2          # torch SAME, stride=1: p = K-1, left = p//2
    cm8 = -(-c_mid // 8) * 8              # 8-aligned bias segment stride
    w_ext = l_tile + 2 * _HALO

    j = pl.program_id(1)

    # ---- conv1 (1x1, BN1 folded into W1) + ReLU; tile and halo separately ----------
    # (concatenation later happens at C_mid width, not C_in width)
    h1_t = jnp.dot(w1_ref[...], x_ref[0], preferred_element_type=jnp.float32)
    h1_t = jnp.maximum(h1_t + b_ref[0:c_mid], 0.0)            # (C_mid, l_tile)
    h1_h = jnp.dot(w1_ref[...], halo_ref[0, 0], preferred_element_type=jnp.float32)
    h1_h = jnp.maximum(h1_h + b_ref[0:c_mid], 0.0)            # (C_mid, 2*_HALO)

    # SAME-pad semantics for conv2: zero every column whose ORIGINAL index is outside
    # [0, L).  Halo columns [0,H) are the left halo (orig = j*lt - H + i), columns
    # [H,2H) are the right halo (orig = (j+1)*lt + i - H).  (1, w) iotas broadcast
    # over the channel rows.
    pos_h = jax.lax.broadcasted_iota(jnp.int32, (1, 2 * _HALO), 1)
    orig_h = jnp.where(pos_h < _HALO,
                       j * l_tile - _HALO + pos_h,
                       j * l_tile + l_tile - _HALO + pos_h)
    h1_h = jnp.where((orig_h >= 0) & (orig_h < seq_len), h1_h, 0.0)
    if mask_tail:  # only when the length axis was padded (ragged tail)
        pos_t = jax.lax.broadcasted_iota(jnp.int32, (1, l_tile), 1)
        h1_t = jnp.where(j * l_tile + pos_t < seq_len, h1_t, 0.0)

    # ---- conv2 (K taps, BN2 folded) as ONE stacked (im2col) matmul + ReLU ----------
    if roll_sign == 0:
        # Fallback: logical [left | tile | right] layout + static lane slices.
        h1_e = jnp.concatenate([h1_h[:, :_HALO], h1_t, h1_h[:, _HALO:]], axis=1)
        pieces = [h1_e[:, _HALO + k - pad_left: _HALO + k - pad_left + l_tile]
                  for k in range(k_taps)]
    else:
        # Circular [tile | right | left] layout: tap k is a pure lane rotation (XLU)
        # followed by an aligned [:l_tile] slice; the big tile piece never shifts.
        h1_c = jnp.concatenate([h1_t, h1_h[:, _HALO:], h1_h[:, :_HALO]], axis=1)
        pieces = []
        for k in range(k_taps):
            s = (roll_sign * (pad_left - k)) % w_ext
            rolled = h1_c if s == 0 else pltpu.roll(h1_c, s, 1)
            pieces.append(rolled[:, :l_tile])
    stacked = jnp.concatenate(pieces, axis=0)                 # (K*C_mid, l_tile)
    h2 = jnp.dot(w2_ref[...], stacked, preferred_element_type=jnp.float32)
    h2 = jnp.maximum(h2 + b_ref[cm8:cm8 + c_mid], 0.0)

    # ---- conv3 (1x1, BN3 folded) + ReLU --------------------------------------------
    h3 = jnp.dot(w3_ref[...], h2, preferred_element_type=jnp.float32)
    h3 = jnp.maximum(h3 + b_ref[2 * cm8:2 * cm8 + c4], 0.0)

    # ---- residual add (re-read x from its VMEM block to keep its live range short) -
    o_ref[0] = (h3 + x_ref[0].astype(jnp.float32)).astype(o_ref.dtype)


def _fold_bn(g, b, m, v, eps):
    s = (g * jax.lax.rsqrt(v + eps)).astype(jnp.float32)
    return s, (b - m * s).astype(jnp.float32)


def bottleneck_block1d(x, w1, w2, w3,
                       g1, be1, m1, v1, g2, be2, m2, v2, g3, be3, m3, v3,
                       eps=1e-5, l_tile=2048):
    """Eval-mode BottleneckBlock1d forward.  x: (B, C_in, L) -> (B, 4*C_out, L).

    x.dtype (f32 or bf16) is used for all HBM I/O (folded weights are cast to the
    same dtype); matmuls accumulate in f32; bias-add / ReLU run in f32.
    """
    B, C_in, L = x.shape
    C_out = w1.shape[0]
    C4 = w3.shape[0]
    K = w2.shape[-1]
    assert C4 == C_in, "residual add without downsample requires in_channels == 4*out_channels"
    assert K - 1 <= _HALO, "kernel_size too large for the fixed halo width"
    assert C_out % 8 == 0, "C_out must be a multiple of 8 (sublane-aligned im2col stack)"
    io_dt = x.dtype
    f32 = jnp.float32

    # ---- fold eval-mode BN into the conv weights / biases (tiny, one-time) ----------
    s1, b1 = _fold_bn(g1, be1, m1, v1, eps)
    s2, b2 = _fold_bn(g2, be2, m2, v2, eps)
    s3, b3 = _fold_bn(g3, be3, m3, v3, eps)
    w1f = (s1[:, None] * w1).astype(io_dt)                               # (C_out, C_in)
    # Stacked (im2col) layout: w2s[o, k*C_out + i] = bn2_scale[o] * w2[o, i, k]
    w2s = jnp.transpose(s2[:, None, None] * w2, (0, 2, 1)).reshape(C_out, K * C_out)
    w2s = w2s.astype(io_dt)
    w3f = (s3[:, None] * w3).astype(io_dt)                               # (C4, C_out)

    # Pack the three bias vectors into one buffer with 8-aligned segments.
    cm8 = -(-C_out // 8) * 8
    c48 = -(-C4 // 8) * 8
    bias = jnp.zeros((2 * cm8 + c48, 1), f32)
    bias = bias.at[0:C_out, 0].set(b1)
    bias = bias.at[cm8:cm8 + C_out, 0].set(b2)
    bias = bias.at[2 * cm8:2 * cm8 + C4, 0].set(b3)

    # ---- pick the length tile --------------------------------------------------------
    cap = max(128, min(l_tile, L) // 128 * 128)
    if B == 1 and L >= 256:
        # keep >= 2 grid steps so dual-TC chips (v7x megacore) stay busy at batch 1
        cap = max(128, min(cap, (L // 2) // 128 * 128))
    lt = None
    if L % 128 == 0:
        for cand in range(cap, 127, -128):
            if L % cand == 0:
                lt = cand
                break
    if lt is not None:          # common path: no pad of x, no output slice
        nL, Lp, x_p, padded = L // lt, L, x, False
    else:                       # ragged L fallback (see TODO at top of file)
        lt = cap
        nL = -(-L // lt)
        Lp = nL * lt
        x_p = jnp.pad(x, ((0, 0), (0, 0), (0, Lp - L)))
        padded = True

    # ---- per-tile halo block, gathered from the narrow boundary windows only --------
    # halo[b, j, :, :H]  = x columns [j*lt-H, j*lt)        (zeros for j == 0)
    # halo[b, j, :, H:]  = x columns [(j+1)*lt, (j+1)*lt+H) (zeros for j == nL-1)
    H = _HALO
    if nL > 1:
        cols = (jnp.arange(1, nL) * lt - H)[:, None] + jnp.arange(2 * H)[None, :]
        bnd = jnp.transpose(x_p[:, :, cols], (0, 2, 1, 3))       # (B, nL-1, C_in, 2H)
        zpad = jnp.zeros((B, 1, C_in, H), io_dt)
        halo = jnp.concatenate(
            [jnp.concatenate([zpad, bnd[..., :H]], axis=1),      # left halos
             jnp.concatenate([bnd[..., H:], zpad], axis=1)],     # right halos
            axis=3)                                              # (B, nL, C_in, 2H)
    else:
        halo = jnp.zeros((B, 1, C_in, 2 * H), io_dt)

    # ---- computed VMEM budget (double-buffered blocks + weights + f32 intermediates) -
    bpe = jnp.dtype(io_dt).itemsize
    w_ext = lt + 2 * H
    est = (2 * bpe * (C_in * lt + C_in * 2 * H + C4 * lt)
           + 2 * bpe * (C_out * C_in + C_out * K * C_out + C4 * C_out)
           + 2 * 4 * (2 * cm8 + c48)
           + 4 * (C_out * w_ext + (K + 2) * C_out * lt + 2 * C4 * lt))
    vmem_limit = int(min(max(est + (8 << 20), 32 << 20), 64 << 20))   # v7x: 64 MiB / TC

    kernel = functools.partial(_bottleneck_kernel, seq_len=L, mask_tail=padded,
                               roll_sign=_roll_lane_sign())

    out = pl.pallas_call(
        kernel,
        out_shape=jax.ShapeDtypeStruct((B, C4, Lp), io_dt),
        grid_spec=pltpu.PrefetchScalarGridSpec(
            num_scalar_prefetch=0,
            grid=(B, nL),
            in_specs=[
                pl.BlockSpec((1, C_in, lt), lambda b, j: (b, 0, j)),              # x tile
                pl.BlockSpec((1, 1, C_in, 2 * H), lambda b, j: (b, j, 0, 0)),     # halo
                pl.BlockSpec((C_out, C_in), lambda b, j: (0, 0)),                 # W1 (BN folded)
                pl.BlockSpec((C_out, K * C_out), lambda b, j: (0, 0)),            # W2 stacked
                pl.BlockSpec((C4, C_out), lambda b, j: (0, 0)),                   # W3 (BN folded)
                pl.BlockSpec((2 * cm8 + c48, 1), lambda b, j: (0, 0)),            # packed biases
            ],
            out_specs=pl.BlockSpec((1, C4, lt), lambda b, j: (b, 0, j)),
        ),
        compiler_params=pltpu.CompilerParams(
            dimension_semantics=("parallel", "parallel"),
            vmem_limit_bytes=vmem_limit),
    )(x_p, halo, w1f, w2s, w3f, bias)

    return out[:, :, :L] if padded else out


def reference(x, w1, w2, w3,
              g1, be1, m1, v1, g2, be2, m2, v2, g3, be3, m3, v3, eps=1e-5):
    def bn(h, g, b, m, v):
        return (g[None, :, None] * (h - m[None, :, None])
                / jnp.sqrt(v[None, :, None] + eps) + b[None, :, None])

    h = jnp.einsum('oi,bil->bol', w1, x)
    h = jax.nn.relu(bn(h, g1, be1, m1, v1))
    K = w2.shape[-1]
    p = K - 1
    pad_l = p // 2
    pad_r = p - pad_l
    h = jax.lax.conv_general_dilated(h, w2, window_strides=(1,),
                                     padding=[(pad_l, pad_r)],
                                     dimension_numbers=('NCH', 'OIH', 'NCH'))
    h = jax.nn.relu(bn(h, g2, be2, m2, v2))
    h = jnp.einsum('oi,bil->bol', w3, h)
    h = jax.nn.relu(bn(h, g3, be3, m3, v3))
    return h + x


if __name__ == "__main__":
    def make_params(key, C_in, C_out, K):
        ks = jax.random.split(key, 15)
        w1 = jax.random.normal(ks[0], (C_out, C_in), jnp.float32) * 0.2
        w2 = jax.random.normal(ks[1], (C_out, C_out, K), jnp.float32) * 0.2
        w3 = jax.random.normal(ks[2], (C_in, C_out), jnp.float32) * 0.2

        def bn(i, C):
            g = 1.0 + 0.1 * jax.random.normal(ks[3 + i], (C,), jnp.float32)
            b = 0.1 * jax.random.normal(ks[6 + i], (C,), jnp.float32)
            m = 0.1 * jax.random.normal(ks[9 + i], (C,), jnp.float32)
            v = jnp.abs(1.0 + 0.1 * jax.random.normal(ks[12 + i], (C,), jnp.float32))
            return g, b, m, v

        g1, be1, m1, v1 = bn(0, C_out)
        g2, be2, m2, v2 = bn(1, C_out)
        g3, be3, m3, v3 = bn(2, C_in)
        return (w1, w2, w3, g1, be1, m1, v1, g2, be2, m2, v2, g3, be3, m3, v3)

    # (B, C_out, K, L, l_tile, dtype, atol, rtol)
    configs = [
        (2, 8, 3, 512, 256, jnp.float32, 2e-3, 2e-3),     # lt | L: no pad, no out slice
        (2, 8, 4, 350, 128, jnp.float32, 2e-3, 2e-3),     # even K + ragged L (pad fallback)
        (1, 16, 5, 512, 2048, jnp.bfloat16, 1e-1, 5e-2),  # bf16 I/O path, B==1 tile split
    ]
    for (B, C_out, K, L, lt, dt, atol, rtol) in configs:
        C_in = 4 * C_out                 # residual add needs in_channels == 4*out_channels
        kx, kp = jax.random.split(jax.random.PRNGKey(0), 2)
        x = jax.random.normal(kx, (B, C_in, L), jnp.float32).astype(dt)
        params = make_params(kp, C_in, C_out, K)

        out = jax.block_until_ready(bottleneck_block1d(x, *params, l_tile=lt))
        ref = jax.block_until_ready(reference(x.astype(jnp.float32), *params))

        assert out.shape == (B, C_in, L)
        outf = out.astype(jnp.float32)
        err = jnp.max(jnp.abs(outf - ref))
        assert jnp.allclose(outf, ref, atol=atol, rtol=rtol), \
            f"max err {err} (dtype={dt}, K={K}, L={L})"
    print("KERNEL_OK")
</pallas_src>

<mosaic_0001>
module attributes {stable_mosaic.version = 11 : i64} {
  func.func @probe(%arg0: memref<8x128xf32, #tpu.memory_space<vmem>>, %arg1: memref<8x128xf32, #tpu.memory_space<vmem>>) attributes {dimension_semantics = [], scalar_prefetch = 0 : i64, scratch_operands = 0 : i64, tpu.core_type = #tpu.core_type<tc>} {
    %c0 = arith.constant 0 : index
    %c0_0 = arith.constant 0 : index
    %0 = vector.load %arg0[%c0, %c0_0] : memref<8x128xf32, #tpu.memory_space<vmem>>, vector<8x128xf32>
    %c1_i32 = arith.constant 1 : i32
    %1 = tpu.dynamic_rotate %0 by %c1_i32 dim 1 : vector<8x128xf32>, i32 -> vector<8x128xf32>
    %c0_1 = arith.constant 0 : index
    %c0_2 = arith.constant 0 : index
    %2 = vector.load %arg1[%c0_1, %c0_2] : memref<8x128xf32, #tpu.memory_space<vmem>>, vector<8x128xf32>
    tpu.vector_store %arg1[%c0_1, %c0_2], %1 {strides = array<i32>} : memref<8x128xf32, #tpu.memory_space<vmem>>, vector<8x128xf32>,
    return
  }
}

module attributes {stable_mosaic.version = 11 : i64} {
  func.func @_bottleneck_kernel(%arg0: i32, %arg1: i32, %arg2: memref<1x32x256xf32, #tpu.memory_space<vmem>>, %arg3: memref<1x1x32x128xf32, #tpu.memory_space<vmem>>, %arg4: memref<8x32xf32, #tpu.memory_space<vmem>>, %arg5: memref<8x24xf32, #tpu.memory_space<vmem>>, %arg6: memref<32x8xf32, #tpu.memory_space<vmem>>, %arg7: memref<48x1xf32, #tpu.memory_space<vmem>>, %arg8: memref<1x32x256xf32, #tpu.memory_space<vmem>>) attributes {dimension_semantics = [#tpu.dimension_semantics<parallel>, #tpu.dimension_semantics<parallel>], iteration_bounds = array<i64: 2, 2>, scalar_prefetch = 0 : i64, scratch_operands = 0 : i64, tpu.core_type = #tpu.core_type<tc>, window_params = [{transform_indices = @transform_0, window_bounds = array<i64: 1, 32, 256>}, {transform_indices = @transform_1, window_bounds = array<i64: 1, 1, 32, 128>}, {pipeline_mode = #tpu.pipeline_mode<synchronous>, transform_indices = @transform_2, window_bounds = array<i64: 8, 32>}, {pipeline_mode = #tpu.pipeline_mode<synchronous>, transform_indices = @transform_3, window_bounds = array<i64: 8, 24>}, {pipeline_mode = #tpu.pipeline_mode<synchronous>, transform_indices = @transform_4, window_bounds = array<i64: 32, 8>}, {pipeline_mode = #tpu.pipeline_mode<synchronous>, transform_indices = @transform_5, window_bounds = array<i64: 48, 1>}, {transform_indices = @transform_6, window_bounds = array<i64: 1, 32, 256>}]} {
    %c0 = arith.constant 0 : index
    %c0_0 = arith.constant 0 : index
    %0 = vector.load %arg4[%c0, %c0_0] : memref<8x32xf32, #tpu.memory_space<vmem>>, vector<8x32xf32>
    %c0_1 = arith.constant 0 : index
    %c0_2 = arith.constant 0 : index
    %c0_3 = arith.constant 0 : index
    %1 = vector.load %arg2[%c0_1, %c0_2, %c0_3] : memref<1x32x256xf32, #tpu.memory_space<vmem>>, vector<1x32x256xf32>
    %2 = vector.shape_cast %1 : vector<1x32x256xf32> to vector<32x256xf32>
    %cst = arith.constant dense<0.000000e+00> : vector<8x256xf32>
    %3 = tpu.matmul %0, %2, %cst {dimension_numbers = #tpu.dot_dimension_numbers<[1], [0], [0], [1], [0, 0, 1, 1], [], []>} : vector<8x32xf32>, vector<32x256xf32>, vector<8x256xf32> -> vector<8x256xf32>
    %c0_4 = arith.constant 0 : index
    %c0_5 = arith.constant 0 : index
    %4 = vector.load %arg7[%c0_4, %c0_5] : memref<48x1xf32, #tpu.memory_space<vmem>>, vector<8x1xf32>
    %5 = vector.broadcast %4 : vector<8x1xf32> to vector<8x256xf32>
    %6 = arith.addf %3, %5 : vector<8x256xf32>
    %cst_6 = arith.constant 0.000000e+00 : f32
    %7 = vector.broadcast %cst_6 : f32 to vector<8x256xf32>
    %8 = arith.maximumf %6, %7 : vector<8x256xf32>
    %c0_7 = arith.constant 0 : index
    %c0_8 = arith.constant 0 : index
    %9 = vector.load %arg4[%c0_7, %c0_8] : memref<8x32xf32, #tpu.memory_space<vmem>>, vector<8x32xf32>
    %c0_9 = arith.constant 0 : index
    %c0_10 = arith.constant 0 : index
    %c0_11 = arith.constant 0 : index
    %c0_12 = arith.constant 0 : index
    %10 = vector.load %arg3[%c0_9, %c0_10, %c0_11, %c0_12] : memref<1x1x32x128xf32, #tpu.memory_space<vmem>>, vector<1x1x32x128xf32>
    %11 = vector.shape_cast %10 : vector<1x1x32x128xf32> to vector<32x128xf32>
    %cst_13 = arith.constant dense<0.000000e+00> : vector<8x128xf32>
    %12 = tpu.matmul %9, %11, %cst_13 {dimension_numbers = #tpu.dot_dimension_numbers<[1], [0], [0], [1], [0, 0, 1, 1], [], []>} : vector<8x32xf32>, vector<32x128xf32>, vector<8x128xf32> -> vector<8x128xf32>
    %c0_14 = arith.constant 0 : index
    %c0_15 = arith.constant 0 : index
    %13 = vector.load %arg7[%c0_14, %c0_15] : memref<48x1xf32, #tpu.memory_space<vmem>>, vector<8x1xf32>
    %14 = vector.broadcast %13 : vector<8x1xf32> to vector<8x128xf32>
    %15 = arith.addf %12, %14 : vector<8x128xf32>
    %cst_16 = arith.constant 0.000000e+00 : f32
    %16 = vector.broadcast %cst_16 : f32 to vector<8x128xf32>
    %17 = arith.maximumf %15, %16 : vector<8x128xf32>
    %18 = tpu.iota {dimensions = array<i32: 1>} : vector<1x128xi32>
    %c64_i32 = arith.constant 64 : i32
    %19 = vector.broadcast %c64_i32 : i32 to vector<1x128xi32>
    %20 = arith.cmpi slt, %18, %19 : vector<1x128xi32>
    %c256_i32 = arith.constant 256 : i32
    %21 = arith.muli %arg1, %c256_i32 : i32
    %c64_i32_17 = arith.constant 64 : i32
    %22 = arith.subi %21, %c64_i32_17 : i32
    %23 = vector.broadcast %22 : i32 to vector<1x128xi32>
    %24 = arith.addi %23, %18 : vector<1x128xi32>
    %c256_i32_18 = arith.constant 256 : i32
    %25 = arith.muli %arg1, %c256_i32_18 : i32
    %c256_i32_19 = arith.constant 256 : i32
    %26 = arith.addi %25, %c256_i32_19 : i32
    %c64_i32_20 = arith.constant 64 : i32
    %27 = arith.subi %26, %c64_i32_20 : i32
    %28 = vector.broadcast %27 : i32 to vector<1x128xi32>
    %29 = arith.addi %28, %18 : vector<1x128xi32>
    %30 = arith.select %20, %24, %29 : vector<1x128xi1>, vector<1x128xi32>
    %c0_i32 = arith.constant 0 : i32
    %31 = vector.broadcast %c0_i32 : i32 to vector<1x128xi32>
    %32 = arith.cmpi sge, %30, %31 : vector<1x128xi32>
    %c512_i32 = arith.constant 512 : i32
    %33 = vector.broadcast %c512_i32 : i32 to vector<1x128xi32>
    %34 = arith.cmpi slt, %30, %33 : vector<1x128xi32>
    %35 = arith.andi %32, %34 : vector<1x128xi1>
    %cst_21 = arith.constant 0.000000e+00 : f32
    %36 = vector.shape_cast %35 : vector<1x128xi1> to vector<1x128xi1>
    %37 = vector.broadcast %36 : vector<1x128xi1> to vector<8x128xi1>
    %38 = vector.broadcast %cst_21 : f32 to vector<8x128xf32>
    %39 = arith.select %37, %17, %38 : vector<8x128xi1>, vector<8x128xf32>
    %40 = vector.extract_strided_slice %39 {offsets = [0, 0], sizes = [8, 64], strides = [1, 1]} : vector<8x128xf32> to vector<8x64xf32>
    %41 = vector.extract_strided_slice %39 {offsets = [0, 64], sizes = [8, 64], strides = [1, 1]} : vector<8x128xf32> to vector<8x64xf32>
    %42 = tpu.concatenate %40, %8, %41 in 1 : vector<8x64xf32>, vector<8x256xf32>, vector<8x64xf32> -> vector<8x384xf32>
    %43 = vector.extract_strided_slice %42 {offsets = [0, 63], sizes = [8, 256], strides = [1, 1]} : vector<8x384xf32> to vector<8x256xf32>
    %44 = vector.extract_strided_slice %42 {offsets = [0, 64], sizes = [8, 256], strides = [1, 1]} : vector<8x384xf32> to vector<8x256xf32>
    %45 = vector.extract_strided_slice %42 {offsets = [0, 65], sizes = [8, 256], strides = [1, 1]} : vector<8x384xf32> to vector<8x256xf32>
    %46 = tpu.concatenate %43, %44, %45 in 0 : vector<8x256xf32>, vector<8x256xf32>, vector<8x256xf32> -> vector<24x256xf32>
    %c0_22 = arith.constant 0 : index
    %c0_23 = arith.constant 0 : index
    %47 = vector.load %arg5[%c0_22, %c0_23] : memref<8x24xf32, #tpu.memory_space<vmem>>, vector<8x24xf32>
    %cst_24 = arith.constant dense<0.000000e+00> : vector<8x256xf32>
    %48 = tpu.matmul %47, %46, %cst_24 {dimension_numbers = #tpu.dot_dimension_numbers<[1], [0], [0], [1], [0, 0, 1, 1], [], []>} : vector<8x24xf32>, vector<24x256xf32>, vector<8x256xf32> -> vector<8x256xf32>
    %c8 = arith.constant 8 : index
    %c0_25 = arith.constant 0 : index
    %49 = vector.load %arg7[%c8, %c0_25] : memref<48x1xf32, #tpu.memory_space<vmem>>, vector<8x1xf32>
    %50 = vector.broadcast %49 : vector<8x1xf32> to vector<8x256xf32>
    %51 = arith.addf %48, %50 : vector<8x256xf32>
    %cst_26 = arith.constant 0.000000e+00 : f32
    %52 = vector.broadcast %cst_26 : f32 to vector<8x256xf32>
    %53 = arith.maximumf %51, %52 : vector<8x256xf32>
    %c0_27 = arith.constant 0 : index
    %c0_28 = arith.constant 0 : index
    %54 = vector.load %arg6[%c0_27, %c0_28] : memref<32x8xf32, #tpu.memory_space<vmem>>, vector<32x8xf32>
    %cst_29 = arith.constant dense<0.000000e+00> : vector<32x256xf32>
    %55 = tpu.matmul %54, %53, %cst_29 {dimension_numbers = #tpu.dot_dimension_numbers<[1], [0], [0], [1], [0, 0, 1, 1], [], []>} : vector<32x8xf32>, vector<8x256xf32>, vector<32x256xf32> -> vector<32x256xf32>
    %c16 = arith.constant 16 : index
    %c0_30 = arith.constant 0 : index
    %56 = vector.load %arg7[%c16, %c0_30] : memref<48x1xf32, #tpu.memory_space<vmem>>, vector<32x1xf32>
    %57 = vector.broadcast %56 : vector<32x1xf32> to vector<32x256xf32>
    %58 = arith.addf %55, %57 : vector<32x256xf32>
    %cst_31 = arith.constant 0.000000e+00 : f32
    %59 = vector.broadcast %cst_31 : f32 to vector<32x256xf32>
    %60 = arith.maximumf %58, %59 : vector<32x256xf32>
    %c0_32 = arith.constant 0 : index
    %c0_33 = arith.constant 0 : index
    %c0_34 = arith.constant 0 : index
    %61 = vector.load %arg2[%c0_32, %c0_33, %c0_34] : memref<1x32x256xf32, #tpu.memory_space<vmem>>, vector<1x32x256xf32>
    %62 = vector.shape_cast %61 : vector<1x32x256xf32> to vector<32x256xf32>
    %63 = arith.addf %60, %62 : vector<32x256xf32>
    %c0_35 = arith.constant 0 : index
    %c0_36 = arith.constant 0 : index
    %c0_37 = arith.constant 0 : index
    %64 = vector.load %arg8[%c0_35, %c0_36, %c0_37] : memref<1x32x256xf32, #tpu.memory_space<vmem>>, vector<1x32x256xf32>
    %65 = vector.shape_cast %64 : vector<1x32x256xf32> to vector<32x256xf32>
    %66 = vector.shape_cast %63 : vector<32x256xf32> to vector<1x32x256xf32>
    tpu.vector_store %arg8[%c0_35, %c0_36, %c0_37], %66 {strides = array<i32>} : memref<1x32x256xf32, #tpu.memory_space<vmem>>, vector<1x32x256xf32>,
    return
  }
  func.func @transform_0(%arg0: i32, %arg1: i32) -> (i32, i32, i32) {
    %c0_i32 = arith.constant 0 : i32
    %c0_i32_0 = arith.constant 0 : i32
    return %arg0, %c0_i32, %arg1 : i32, i32, i32
  }
  func.func @transform_1(%arg0: i32, %arg1: i32) -> (i32, i32, i32, i32) {
    %c0_i32 = arith.constant 0 : i32
    %c0_i32_0 = arith.constant 0 : i32
    %c0_i32_1 = arith.constant 0 : i32
    return %arg0, %arg1, %c0_i32, %c0_i32_0 : i32, i32, i32, i32
  }
  func.func @transform_2(%arg0: i32, %arg1: i32) -> (i32, i32) {
    %c0_i32 = arith.constant 0 : i32
    %c0_i32_0 = arith.constant 0 : i32
    %c0_i32_1 = arith.constant 0 : i32
    return %c0_i32, %c0_i32_0 : i32, i32
  }
  func.func @transform_3(%arg0: i32, %arg1: i32) -> (i32, i32) {
    %c0_i32 = arith.constant 0 : i32
    %c0_i32_0 = arith.constant 0 : i32
    %c0_i32_1 = arith.constant 0 : i32
    return %c0_i32, %c0_i32_0 : i32, i32
  }
  func.func @transform_4(%arg0: i32, %arg1: i32) -> (i32, i32) {
    %c0_i32 = arith.constant 0 : i32
    %c0_i32_0 = arith.constant 0 : i32
    %c0_i32_1 = arith.constant 0 : i32
    return %c0_i32, %c0_i32_0 : i32, i32
  }
  func.func @transform_5(%arg0: i32, %arg1: i32) -> (i32, i32) {
    %c0_i32 = arith.constant 0 : i32
    %c0_i32_0 = arith.constant 0 : i32
    %c0_i32_1 = arith.constant 0 : i32
    return %c0_i32, %c0_i32_0 : i32, i32
  }
  func.func @transform_6(%arg0: i32, %arg1: i32) -> (i32, i32, i32) {
    %c0_i32 = arith.constant 0 : i32
    %c0_i32_0 = arith.constant 0 : i32
    return %arg0, %c0_i32, %arg1 : i32, i32, i32
  }
}

</mosaic_0001>

<bundles_post_ra>
// kernel: tpu_custom_call.1
= control target key start
LH: loop header
LB: loop body
LE: loop exit
PB: predicated region body
PF: predicated region fallthrough
CT: control target
= control target key end

     0   :  { %6 = vsyncpa [#allocation3], 0  ;;  %s128_s0 = inlined_call_operand.hbm [shape: f32[8,128], index: 0, kind: input, shape index: {}]   ;;  %s129_s1 = inlined_call_operand.hbm [shape: f32[8,128], index: 1, kind: output, shape index: {}]  }
   0x1   :  { %7 = vsyncpa [#allocation4], 0  ;;  %s91_s6 = smov [#allocation2]   ;;  %s43_s10 = scalar_lea.hbm %s128_s0, 128 }
   0x2   :  { %s14_s7 = sshll.u32 %s91_s6, 4  ;;  %p44_p0 = scmp.ne.s32.totalorder %s128_s0, %s43_s10  ;;  %s15_s7 = int_to_ptr.vmem [resolvable:$true] %s14_s7 }
   0x3   :  { %p47_p1 = scmp.lt.u32.totalorder %s43_s10, %s128_s0 }
   0x5   :  { %p49_p2 = pnand %p47_p1, %p44_p0 }
   0x7   :  { %52 = shalt.err (!%p49_p2)
}
   0x8   :  { %s53_s15 = scalar_lea.vmem %s15_s7, 128  ;;  %p58_p4 = scmp.lt.s32.totalorder %s15_s7, %s15_s7 }
   0x9   :  { %p54_p3 = scmp.ne.s32.totalorder %s15_s7, %s53_s15  ;;  %p59_p5 = scmp.lt.s32.totalorder %s53_s15, %s53_s15 }
   0xb   :  { %p60_p6 = por %p59_p5, %p58_p4 }
   0xd   :  { %p61_p7 = pnand %p60_p6, %p54_p3 }
   0xf   :  { %64 = shalt.err (!%p61_p7)
}
  0x10   :  { %17 = dma.hbm_to_vmem [thread:$0]  %s128_s0, 128, %s15_s7, [#allocation3]  }
  0x11   :  { %87 = dma.done.wait [#allocation3], 128  }
  0x12   :  { %88 = vsyncadd [#allocation3], 4294967168  ;;  %v21_v0 = vld [vmem:[#allocation2] sm:$0xff]  ;;  %s92_s18 = smov 1   ;;  %s93_s19 = smov [#allocation5]  }
  0x13   :  { %22 = vrot.lane.b32.xlu0 %v21_v0, %s92_s18  ;;  %s31_s20 = sshll.u32 %s93_s19, 4  ;;  %s32_s20 = int_to_ptr.vmem [resolvable:$true] %s31_s20 }
  0x14   :  { %s65_s21 = scalar_lea.vmem %s32_s20, 128  ;;  %p70_p9 = scmp.lt.s32.totalorder %s32_s20, %s32_s20 }
  0x15   :  { %p66_p8 = scmp.ne.s32.totalorder %s32_s20, %s65_s21  ;;  %p71_p10 = scmp.lt.s32.totalorder %s65_s21, %s65_s21 }
  0x17   :  { %p72_p11 = por %p71_p10, %p70_p9 }
  0x19   :  { %p73_p12 = pnand %p72_p11, %p66_p8 }
  0x85   :  { %v23_v1 = vpop.permute.xlu0 %22 }
  0x86   :  { %24 = vst [vmem:[#allocation5] sm:$0xff] %v23_v1 }
  0x87   :  { %76 = shalt.err (!%p73_p12)
}
  0x88   :  { %s77_s0 = scalar_lea.hbm %s129_s1, 128 }
  0x89   :  { %p78_p13 = scmp.ne.s32.totalorder %s129_s1, %s77_s0  ;;  %p81_p0 = scmp.lt.u32.totalorder %s77_s0, %s129_s1 }
  0x8b   :  { %p83_p1 = pnand %p81_p0, %p78_p13 }
  0x8d   :  { %86 = shalt.err (!%p83_p1)
}
  0x8e   :  { %34 = dma.vmem_to_hbm [thread:$0]  %s32_s20, 128, %s129_s1, [#allocation4]  }
  0x8f   :  { %89 = dma.done.wait [#allocation4], 128  }
  0x90   :  { %90 = vsyncadd [#allocation4], 4294967168 }
  0x91   :  { %38 = vsyncpa [#allocation3], 1 }
  0x92   :  { %39 = vsyncpa [#allocation4], 1 }

// kernel: tpu_custom_call.1
= control target key start
LH: loop header
LB: loop body
LE: loop exit
PB: predicated region body
PF: predicated region fallthrough
CT: control target
= control target key end

     0   :  { %s1701_s0 = inlined_call_operand.hbm [shape: f32[2,32,512], index: 0, kind: input, shape index: {}]   ;;  %s1702_s1 = inlined_call_operand.hbm [shape: f32[2,2,32,128], index: 1, kind: input, shape index: {}]   ;;  %s1703_s2 = inlined_call_operand.vmem [shape: f32[8,32], index: 2, kind: input, shape index: {}]   ;;  %s1704_s3 = inlined_call_operand.vmem [shape: f32[8,24], index: 3, kind: input, shape index: {}]   ;;  %s1705_s4 = inlined_call_operand.vmem [shape: f32[32,8], index: 4, kind: input, shape index: {}]   ;;  %s1706_s5 = inlined_call_operand.vmem [shape: f32[48,1], index: 5, kind: input, shape index: {}]   ;;  %s1707_s6 = inlined_call_operand.hbm [shape: f32[2,32,512], index: 6, kind: output, shape index: {}]  }
   0x1   :  { %1718 = sst [smem:[#allocation18_spill]] %s1701_s0 }
   0x2   :  { %1719 = sst [smem:[#allocation19_spill]] %s1707_s6 }
   0x3   :  { %11 = vsyncpa [#allocation3], 0 }
   0x4   :  { %13 = vsyncpa [#allocation3 + $0x1], 0 }
   0x5   :  { %14 = vsyncpa [#allocation6], 0 }
   0x6   :  { %16 = vsyncpa [#allocation6 + $0x1], 0 }
   0x7   :  { %17 = vsyncpa [#allocation4], 0 }
   0x8   :  { %19 = vsyncpa [#allocation4 + $0x1], 0  ;;  %s1357_s21 = smov 0   ;;  %s1359_s22 = smov 0  }
   0x9   :  { %s1361_s23 = smov 0   ;;  %s1363_s24 = smov 0  }
   0xa   :  { %s1365_s25 = smov 0   ;;  %s1367_s26 = smov 0  }
   0xb   :  { %s1369_s27 = smov 0   ;;  %s1371_s28 = smov 0  }
   0xc LB: > { %1720 = sst [smem:[#allocation11_spill]] %s1273_s21  ;;  %s951_s29 = sadd.s32 4294967295, %s1301_s28   ;;  %s1301_s28 = sphi %s1371_s28, %s25_s28   ;;  %s1297_s27 = sphi %s1369_s27, %s1751_s27   ;;  %s1293_s26 = sphi %s1367_s26, %s1750_s26   ;;  %s1289_s25 = sphi %s1365_s25, %s1749_s25   ;;  %s1285_s24 = sphi %s1363_s24, %s1748_s24   ;;  %s1281_s23 = sphi %s1361_s23, %s1743_s23   ;;  %s1277_s22 = sphi %s1359_s22, %s1747_s22   ;;  %s1273_s21 = sphi %s1357_s21, %s1746_s21  }
   0xd   : > { %1721 = sst [smem:[#allocation12_spill]] %s1281_s23  ;;  %s952_s30 = sadd.s32 4294967294, %s1301_s28  }
   0xe   : > { %s34_s7 = sadd.s32 1, %s1293_s26  ;;  %s37_s8 = sadd.s32 1, %s1297_s27 }
   0xf   : > { %p35_p0 = scmp.ge.s32.totalorder %s34_s7, 2  ;;  %s46_s9 = sadd.s32 1, %s1281_s23 }
  0x10   : > { %p53_p1 = scmp.ne.s32.totalorder %s1281_s23, %s1277_s22  ;;  %p54_p2 = scmp.eq.s32.totalorder %s1301_s28, 0 }
  0x11   : > { %s1753_s7 = smov (%p35_p0, %s34_s7), 0  ;;  %s1755_s8 = smov (!%p35_p0, %s37_s8), %s1297_s27 }
  0x12   : > { %1722 = sst [smem:[#allocation13_spill]] %s1753_s7  ;;  %s42_s10 = ssub.s32 %s1293_s26, %s1753_s7 }
  0x13   : > { %p1410_p3 = por %p54_p2, %p53_p1  ;;  %p39_p4 = scmp.ge.s32.totalorder %s1755_s8, 2 }
  0x14   : > { %p59_p5 = scmp.ne.s32.totalorder %s1277_s22, %s1273_s21  ;;  %p60_p6 = scmp.eq.s32.totalorder %s951_s29, 0 }
  0x15   : > { %p197_p7 = scmp.eq.s32.totalorder %s951_s29, 3  ;;  %s1757_s8 = smov (%p39_p4, %s1755_s8), 0 }
  0x16   : > { %1724 = sst [smem:[#allocation14_spill]] %s1757_s8  ;;  %p1418_p8 = por %p60_p6, %p59_p5 }
  0x17   : > { %p1422_p9 = por %p197_p7, %p53_p1  ;;  %s41_s14 = ssub.s32 %s1297_s27, %s1757_s8 }
  0x18   : > { %s1725_s12 = scalar_select %p1418_p8, 1, 0 }
  0x19   : > { %s1726_s13 = scalar_select %p1422_p9, 1, 0 }
  0x1a   : > { %p203_p10 = scmp.eq.s32.totalorder %s952_s30, 3  ;;  %s43_s15 = sor.u32 %s42_s10, %s41_s14 }
  0x1b   : > { %1727 = sst [smem:[#allocation15_spill]] %s1726_s13  ;;  %p44_p11 = scmp.eq.s32.totalorder %s43_s15, 0 }
  0x1c   : > { %p1428_p12 = por %p203_p10, %p59_p5  ;;  %p1035_p13 = scmp.lt.s32.totalorder %s1301_s28, 4 }
  0x1d   : > { %s1434_s17 = sand.u32 1, %s1281_s23   ;;  %s956_s20 = sshll.u32 %s1293_s26, 1 }
  0x1e   : > { %s1728_s16 = scalar_select %p1428_p12, 1, 0 }
  0x1f   : > { %s1437_s18 = scalar_select %p44_p11, %s1281_s23, %s46_s9  }
  0x20   : > { %1729 = sst [smem:[#allocation16_spill]] %s1728_s16  ;;  %s955_s19 = sshll.u32 %s1434_s17, 6 }
  0x21   : > { %1730 = sst [smem:[#allocation17_spill]] %s1437_s18  ;;  %s957_s29 = sshll.u32 %s1297_s27, 4 }
  0x22   : > { %s239_s8 = scalar_lea.vmem [#allocation2], %s955_s19  ;;  %s245_s30 = sadd.s32 %s957_s29, %s956_s20 }
  0x23   : > { %s248_s7 = sshll.u32 %s239_s8, 4  ;;  %s958_s10 = sshll.u32 %s245_s30, 7  ;;  %s1442_s7 = int_to_ptr.vmem [resolvable:$true] %s248_s7 }
  0x24   : > { %p1446_p0 = pnand %p1035_p13, %p1410_p3  ;;  %s1732_s0 = sld [smem:[#allocation18_spill]] }
  0x25   : > { %s236_s8 = scalar_lea.sflag [#allocation3], %s1434_s17 }
  0x26   : > { %p1141_p3 = pneg %p1446_p0 }
  0x2a   : > { %s1453_s9 = scalar_lea.hbm %s1732_s0, %s958_s10  ;;  %s1144_s20 = scalar_lea.hbm %s1732_s0, 4096 }
  0x2b   : > { %s1139_s19 = scalar_lea.hbm %s1453_s9, 1024  ;;  %p1145_p6 = scmp.lt.u32.totalorder %s1453_s9, %s1732_s0 }
  0x2c   : > { %p1140_p2 = scmp.ne.s32.totalorder %s1453_s9, %s1139_s19  ;;  %p1146_p7 = scmp.lt.u32.totalorder %s1144_s20, %s1139_s19 }
  0x2d   : > { %p1148_p11 = scmp.lt.u32.totalorder %s1139_s19, %s1453_s9 }
  0x2e   : > { %p1142_p4 = pnand %p1141_p3, %p1140_p2  ;;  %p1147_p10 = por %p1146_p7, %p1145_p6 }
  0x30   : > { %p1143_p5 = pneg %p1142_p4  ;;  %p1149_p13 = por %p1148_p11, %p1147_p10 }
  0x32   : > { %p1150_p1 = pnand %p1149_p13, %p1143_p5 }
  0x34   : > { %1153 = shalt.err (!%p1150_p1)
}
  0x35   : > { %s1154_s10 = scalar_lea.vmem %s1442_s7, 1024  ;;  %s1303_s15 = smov [#allocation2]  }
  0x36   : > { %p1155_p2 = scmp.ne.s32.totalorder %s1442_s7, %s1154_s10  ;;  %s1159_s11 = sshll.u32 %s1303_s15, 4  ;;  %s1160_s11 = int_to_ptr.vmem [resolvable:$false] %s1159_s11 }
  0x37   : > { %s1161_s16 = scalar_lea.vmem %s1160_s11, 2048  ;;  %p1162_p9 = scmp.lt.s32.totalorder %s1442_s7, %s1160_s11 }
  0x38   : > { %p1157_p4 = pnand %p1155_p2, %p1141_p3  ;;  %p1163_p6 = scmp.lt.s32.totalorder %s1161_s16, %s1154_s10 }
  0x3a   : > { %p1158_p12 = pneg %p1157_p4  ;;  %p1164_p7 = por %p1163_p6, %p1162_p9 }
  0x3c   : > { %p1165_p10 = pnand %p1164_p7, %p1158_p12 }
  0x3e   : > { %1168 = shalt.err (!%p1165_p10)
}
  0x3f   : > { %s1304_s19 = smov 512   ;;  %s1305_s20 = smov 256  }
  0x40   : > { %s1306_s29 = smov 16   ;;  %p279_p9 = scmp.lt.s32.totalorder %s1301_s28, 5 }
  0x41   : > { %1027 = dma.hbm_to_vmem [thread:$0]  (!%p1446_p0), %s1453_s9, 1024, %s1442_s7, %s236_s8, %s1304_s19, %s1305_s20, %s1306_s29  }
  0x42   : > { %s959_s30 = sshll.u32 %s1434_s17, 5  ;;  %s960_s10 = sshll.u32 %s1293_s26, 2 }
  0x43   : > { %p1733_p12 = scmp.ge.s32.totalorder %s1301_s28, 1  ;;  %s961_s11 = sshll.u32 %s1297_s27, 3 }
  0x44   : > { %s262_s16 = scalar_lea.vmem [#allocation5], %s959_s30  ;;  %s268_s18 = sadd.s32 %s961_s11, %s960_s10 }
  0x45   : > { %p1489_p1 = pnand %p1733_p12, %p279_p9  ;;  %s271_s0 = sshll.u32 %s262_s16, 4  ;;  %s1494_s0 = int_to_ptr.vmem [resolvable:$true] %s271_s0 }
  0x46   : > { %s962_s23 = sshll.u32 %s268_s18, 7  ;;  %s259_s7 = scalar_lea.sflag [#allocation6], %s1434_s17 }
  0x47   : > { %s1499_s13 = scalar_lea.hbm %s1702_s1, %s962_s23  ;;  %s1174_s18 = scalar_lea.hbm %s1702_s1, 2048 }
  0x48   : > { %s1169_s9 = scalar_lea.hbm %s1499_s13, 512  ;;  %p1175_p2 = scmp.lt.u32.totalorder %s1499_s13, %s1702_s1 }
  0x49   : > { %p1170_p5 = scmp.ne.s32.totalorder %s1499_s13, %s1169_s9  ;;  %p1176_p4 = scmp.lt.u32.totalorder %s1174_s18, %s1169_s9 }
  0x4a   : > { %p1178_p7 = scmp.lt.u32.totalorder %s1169_s9, %s1499_s13 }
  0x4b   : > { %p1172_p11 = pnand %p1170_p5, %p1141_p3  ;;  %p1177_p6 = por %p1176_p4, %p1175_p2 }
  0x4d   : > { %p1173_p13 = pneg %p1172_p11  ;;  %p1179_p10 = por %p1178_p7, %p1177_p6 }
  0x4f   : > { %p1180_p9 = pnand %p1179_p10, %p1173_p13 }
  0x51   : > { %1183 = shalt.err (!%p1180_p9)
}
  0x52   : > { %s1184_s6 = scalar_lea.vmem %s1494_s0, 512  ;;  %s1307_s21 = smov [#allocation5]  }
  0x53   : > { %p1185_p12 = scmp.ne.s32.totalorder %s1494_s0, %s1184_s6  ;;  %s1189_s23 = sshll.u32 %s1307_s21, 4  ;;  %s1190_s23 = int_to_ptr.vmem [resolvable:$false] %s1189_s23 }
  0x54   : > { %s1191_s30 = scalar_lea.vmem %s1190_s23, 1024  ;;  %p1192_p8 = scmp.lt.s32.totalorder %s1494_s0, %s1190_s23 }
  0x55   : > { %p1187_p5 = pnand %p1185_p12, %p1141_p3  ;;  %p1193_p2 = scmp.lt.s32.totalorder %s1191_s30, %s1184_s6 }
  0x57   : > { %p1188_p11 = pneg %p1187_p5  ;;  %p1194_p4 = por %p1193_p2, %p1192_p8 }
  0x59   : > { %p1195_p6 = pnand %p1194_p4, %p1188_p11 }
  0x5b   : > { %1198 = shalt.err (!%p1195_p6)
}
  0x5c   : > { %s1308_s10 = smov 128   ;;  %s1309_s11 = smov 8  }
  0x5d   : > { %1030 = dma.hbm_to_vmem [thread:$0]  (!%p1446_p0), %s1499_s13, 512, %s1494_s0, %s259_s7, %s1308_s10, %s1308_s10, %s1309_s11  }
  0x5e   : > { %283 = sbr.rel (%p1489_p1) target bundleno = 1160 (0x488), region = 44  ;;  %s1530_s16 = sand.u32 (!%p1489_p1), 1, %s1277_s22  }
  0x5f   : > { %s964_s9 = sshll.u32 (!%p1489_p1), %s1530_s16, 6  ;;  %s286_s8 = scalar_lea.sflag (!%p1489_p1), [#allocation3], %s1530_s16 }
  0x60   : > { %s1536_s19 = scalar_lea.vmem (!%p1489_p1), [#allocation2], %s964_s9  ;;  %p1735_p8 = scmp.ne.s32.totalorder (!%p1489_p1), %s1725_s12, 0 }
  0x65   : > { %1260 = dma.done.wait (%p1735_p8), %s286_s8, 1024  }
  0x66   : > { %1262 = vsyncadd (%p1735_p8), %s286_s8, 4294966272  ;;  %s965_s0 = sshll.u32 %s1530_s16, 5  ;;  %s295_s13 = scalar_lea.sflag [#allocation6], %s1530_s16 }
  0x67   : > { %s298_s17 = scalar_lea.vmem [#allocation5], %s965_s0 }
  0x68   : > { %1264 = dma.done.wait (%p1735_p8), %s295_s13, 512  }
  0x69   : > { %1266 = vsyncadd (%p1735_p8), %s295_s13, 4294966784  ;;  %v1310_v0 = vmov 0.0|0.0   ;;  %v1311_v1 = vmov 0.0   ;;  %vm1312_vm0 = vmmov 0   ;;  %v1313_v2 = vmov 0   ;;  %v1551_v3 = vld [vmem:[%s1536_s19 + $0x8] sm:$0xff] }
  0x6a   : > { %1006 = vmatprep.subr.bf16.mxu1 %v1310_v0  ;;  %417 = vmatprep.mubr.f32.mxu0 %v1311_v1  ;;  %v1554_v4 = vld [vmem:[%s1536_s19 + $0x18] sm:$0xff]  ;;  %v1557_v5 = vld [vmem:[%s1536_s19] sm:$0xff]  ;;  %v1562_v7 = vld [vmem:[%s1536_s19 + $0x10] sm:$0xff]  ;;  %vm349_vm1 = vcmask 261120   ;;  %s1314_s18 = smov 64   ;;  %s969_s20 = sshll.u32 %s1285_s24, 8  ;;  %v501_v32 = vlaneseq }
  0x6b   : > { %995 = vmatprep.mubr.msk.f32.mxu1 %vm1312_vm0, %v1311_v1  ;;  %1117 = vset.pattern.permute.xlu0 %v1313_v2  ;;  %v998_v6 = vpack.c.bf16 %v1554_v4, %v1551_v3  ;;  %v426_v8 = vld [vmem:[%s298_s17] sm:$0xff]  ;;  %v427_v9 = vld [vmem:[%s298_s17 + $0x8] sm:$0xff]  ;;  %v1000_v10 = vpack.c.bf16 %v1562_v7, %v1557_v5  ;;  %v1570_v13 = vld [vmem:[%s1536_s19 + $0x38] sm:$0xff]  ;;  %s970_s29 = sadd.s32 4294967232, %s969_s20  ;;  %s508_s6 = sadd.s32 192, %s969_s20  ;;  %vm524_vm6 = vcmask 523264  }
  0x6c   : > { %1138 = vset.pattern.permute.xlu1 %v1313_v2  ;;  %v1007_v11 = vpack.c.bf16 %v427_v9, %v426_v8  ;;  %v1567_v12 = vld [vmem:[%s1536_s19 + $0x28] sm:$0xff]  ;;  %v1573_v14 = vld [vmem:[%s1536_s19 + $0x20] sm:$0xff]  ;;  %v1578_v16 = vld [vmem:[%s1536_s19 + $0x30] sm:$0xff]  ;;  %v502_v33 = vand.u32 127, %v501_v32  ;;  %v506_v34 = vstv %s970_s29  ;;  %s1315_s21 = smov 127   ;;  %s1316_s23 = smov 126  }
  0x6d   : > { %999 = vmatprep.subr.bf16.mxu0 %v998_v6  ;;  %v1002_v15 = vpack.c.bf16 %v1570_v13, %v1567_v12  ;;  %v428_v17 = vld [vmem:[%s298_s17 + $0x10] sm:$0xff]  ;;  %v429_v18 = vld [vmem:[%s298_s17 + $0x18] sm:$0xff]  ;;  %v1004_v19 = vpack.c.bf16 %v1578_v16, %v1573_v14  ;;  %v343_v21 = vld [vmem:[%s1706_s5] sm:$0xff]  ;;  %v509_v35 = vstv %s508_s6  ;;  %s1317_s30 = smov 65   ;;  %vm538_vm7 = vcmask 1039360   ;;  %s977_s8 = sshll.u32 %s1285_s24, 1 }
  0x6e   : > { %1001 = vmatpush1.bf16.msra.mxu0 %v1000_v10  ;;  %1008 = vmatpush3.bf16.msra.mxu1 %v1007_v11  ;;  %v1010_v20 = vpack.c.bf16 %v429_v18, %v428_v17  ;;  %v334_v22 = vld [vmem:[%s1703_s2] sm:$0xff]  ;;  %v507_v36 = vadd.s32 %v506_v34, %v502_v33  ;;  %v510_v37 = vadd.s32 %v509_v35, %v502_v33  ;;  %vm503_vm2 = vcmp.lt.s32.totalorder %v502_v33, 64  ;;  %v551_v60 = vld [vmem:[%s1706_s5 + $0x8] sm:$0xff]  ;;  %v670_v62 = vld [vmem:[%s1706_s5 + $0x18] sm:$0xff]  ;;  %s978_s19 = sshll.u32 %s1289_s25, 4  ;;  %s331_s0 = scalar_lea.vmem [#allocation7], %s964_s9 }
  0x6f   : > { %1003 = vmatprep.subr.bf16.mxu0 %v1002_v15  ;;  %1009 = vmatprep.subr.bf16.mxu1 %v1310_v0  ;;  %vm547_vm8 = vcmask 1031168   ;;  %v672_v63 = vld [vmem:[%s1706_s5 + $0x28] sm:$0xff]  ;;  %vm575_vm9 = vcmask 531456   ;;  %vm588_vm10 = vcmask 195584   ;;  %vm693_vm11 = vcmask 64512   ;;  %s832_s13 = sadd.s32 %s978_s19, %s977_s8  ;;  %s835_s24 = sshll.u32 %s331_s0, 4  ;;  %s1640_s24 = int_to_ptr.vmem [resolvable:$true] %s835_s24 }
  0x70   : > { %346 = vperm.xlu0 %1117, %v343_v21   ;;  %v511_v38 = vsel %vm503_vm2, %v507_v36, %v510_v37  ;;  %s1736_s25 = sld [smem:[#allocation15_spill]]  ;;  %s979_s9 = sshll.u32 %s832_s13, 7 }
  0x71   : > { %vm512_vm3 = vcmp.ge.s32.totalorder %v511_v38, 0  ;;  %vm513_vm4 = vcmp.lt.s32.totalorder %v511_v38, 512  ;;  %s1737_s14 = sld [smem:[#allocation19_spill]]  ;;  %s820_s7 = scalar_lea.sflag [#allocation4], %s1530_s16 }
  0x72   : > { %1005 = vmatpush1.bf16.msra.mxu0 %v1004_v19  ;;  %1011 = vmatpush3.bf16.msra.mxu1 %v1010_v20  ;;  %vm514_vm5 = vmand %vm512_vm3, %vm513_vm4  ;;  %s1318_s20 = smov [#allocation7]  }
  0x73   : > { %s1203_s29 = sshll.u32 %s1318_s20, 4  ;;  %s1204_s29 = int_to_ptr.vmem [resolvable:$false] %s1203_s29 }
  0x74   : > { %s1205_s6 = scalar_lea.vmem %s1204_s29, 2048  ;;  %p1206_p7 = scmp.lt.s32.totalorder %s1640_s24, %s1204_s29 }
  0x75   : > { %967 = vmatmul.mubr.msk.f32.vlgmr.msra.gmra.mrb[0].mxu0 %vm349_vm1, %v334_v22  ;;  %996 = vmatmul.mubr.msk.f32.vlgmr.msra.gmra.mrb[0].mxu1 %vm349_vm1, %v334_v22 }
  0x76   : > { %656 = vmatprep.mubr.f32.mxu0 %v1311_v1  ;;  %776 = vmatprep.mubr.f32.mxu1 %v1311_v1  ;;  %p1738_p3 = scmp.ne.s32.totalorder %s1736_s25, 0 }
  0x77   : > { %s1646_s15 = scalar_lea.hbm %s1737_s14, %s979_s9 }
  0xef   : > { %v347_v23 = vpop.permute.xlu0 %346 }
 0x148   : > { %v419_v24 = vpop.f32.mrb[0].mxu0  ;;  %v496_v25 = vpop.f32.mrb[0].mxu1 }
 0x149   : > { %v420_v26 = vadd.f32 %v419_v24, %v347_v23  ;;  %v421_v27 = vpop.f32.mrb[1].mxu0  ;;  %v997_v28 = vpop.f32.mrb[1].mxu1  ;;  %v497_v39 = vadd.f32 %v496_v25, %v347_v23 }
 0x14a   : > { %v422_v29 = vadd.f32 %v421_v27, %v347_v23 }
 0x14b   : > { %v424_v30 = vmax.f32 %v420_v26, 0.0  ;;  %v500_v40 = vmax.f32 %v497_v39, 0.0  ;;  %v666_v39 = vld [vmem:[%s1705_s4 + $0x8] sm:$0xff] }
 0x14c   : > { %v425_v31 = vmax.f32 %v422_v29, 0.0  ;;  %v550_v29 = vld [vmem:[%s1704_s3] sm:$0xff] }
 0x14d   : > { %520 = vrot.lane.b32.xlu0 %v424_v30, %s1314_s18  ;;  %v517_v41 = vsel %vm514_vm5, %v500_v40, 0.0  ;;  %v669_v30 = vld [vmem:[%s1706_s5 + $0x10] sm:$0xff]  ;;  %v665_v40 = vld [vmem:[%s1705_s4] sm:$0xff] }
 0x14e   : > { %522 = vrot.lane.b32.xlu1 %v425_v31, %s1314_s18  ;;  %v671_v31 = vld [vmem:[%s1706_s5 + $0x20] sm:$0xff]  ;;  %s1199_s18 = scalar_lea.vmem %s1640_s24, 1024 }
 0x14f   : > { %p1200_p0 = scmp.ne.s32.totalorder %s1640_s24, %s1199_s18  ;;  %p1207_p10 = scmp.lt.s32.totalorder %s1205_s6, %s1199_s18 }
 0x151   : > { %p1201_p1 = pnand %p1200_p0, %p1738_p3  ;;  %p1208_p9 = por %p1207_p10, %p1206_p7 }
 0x153   : > { %p1202_p13 = pneg %p1201_p1 }
 0x155   : > { %p1209_p12 = pnand %p1208_p9, %p1202_p13 }
 0x1bf   : > { %v521_v42 = vpop.permute.xlu0 %520 }
 0x1c0   : > { %v523_v43 = vpop.permute.xlu1 %522  ;;  %v528_v44 = vsel %vm524_vm6, %v517_v41, %v521_v42 }
 0x1c1   : > { %v525_v45 = vsel %vm524_vm6, %v521_v42, %v523_v43  ;;  %v529_v46 = vsel %vm524_vm6, %v523_v43, %v517_v41  ;;  %532 = vrot.lane.b32.xlu0 %v528_v44, %s1315_s21  ;;  %v667_v41 = vld [vmem:[%s1705_s4 + $0x10] sm:$0xff]  ;;  %v668_v42 = vld [vmem:[%s1705_s4 + $0x18] sm:$0xff] }
 0x1c2   : > { %v1118_v47 = vpack.i.bf16 %v529_v46, %v525_v45 }
 0x1c4   : > { %1119 = vrot.lane.b32.xlu1 %v1118_v47, %s1315_s21 }
 0x1c5   : > { %545 = vrot.lane.b32.xlu0 %v529_v46, %s1316_s23 }
 0x1c8   : > { %543 = vrot.lane.b32.xlu1 %v525_v45, %s1316_s23 }
 0x1c9   : > { %1124 = vrot.lane.b32.xlu0 %v1118_v47, %s1317_s30 }
 0x1cc   : > { %541 = vrot.lane.b32.xlu1 %v528_v44, %s1316_s23 }
 0x233   : > { %v533_v51 = vpop.permute.xlu0 %532 }
 0x236   : > { %v1120_v48 = vpop.permute.xlu1 %1119 }
 0x237   : > { %v1122_v49 = vunpack.i.h.bf16 %v1120_v48  ;;  %v1121_v50 = vunpack.i.l.bf16 %v1120_v48  ;;  %v546_v57 = vpop.permute.xlu0 %545 }
 0x239   : > { %v540_v52 = vsel %vm538_vm7, %v1121_v50, %v1122_v49  ;;  %v539_v53 = vsel %vm538_vm7, %v533_v51, %v1121_v50 }
 0x23a   : > { %v1128_v54 = vpack.i.bf16 %v1122_v49, %v540_v52  ;;  %v544_v55 = vpop.permute.xlu1 %543  ;;  %v1133_v56 = vpack.i.bf16 %v539_v53, %v528_v44 }
 0x23b   : > { %v549_v58 = vsel %vm547_vm8, %v544_v55, %v546_v57  ;;  %v1125_v0 = vpop.permute.xlu0 %1124 }
 0x23c   : > { %1129 = vrot.lane.b32.xlu1 %v1128_v54, %s1317_s30  ;;  %1134 = vrot.lane.b32.xlu0 %v1133_v56, %s1317_s30  ;;  %v1127_v2 = vunpack.i.h.bf16 %v1125_v0  ;;  %v1126_v6 = vunpack.i.l.bf16 %v1125_v0 }
 0x23e   : > { %v542_v59 = vpop.permute.xlu1 %541  ;;  %v577_v20 = vsel %vm575_vm9, %v1126_v6, %v1127_v2 }
 0x23f   : > { %v548_v61 = vsel %vm547_vm8, %v542_v59, %v544_v55 }
 0x240   : > { %571 = vrot.lane.b32.xlu1 %v549_v58, %s1317_s30  ;;  %573 = vrot.lane.b32.xlu0 %v546_v57, %s1317_s30 }
 0x244   : > { %569 = vrot.lane.b32.xlu1 %v548_v61, %s1317_s30  ;;  %554 = vperm.xlu0 %1117, %v551_v60  }
 0x248   : > { %680 = vperm.xlu0 %1117, %v670_v62   ;;  %675 = vperm.xlu1 %1138, %v669_v30  }
 0x24c   : > { %690 = vperm.xlu0 %1117, %v672_v63   ;;  %685 = vperm.xlu1 %1138, %v671_v31  }
 0x2ae   : > { %v1130_v8 = vpop.permute.xlu1 %1129  ;;  %v1135_v9 = vpop.permute.xlu0 %1134 }
 0x2af   : > { %v1132_v10 = vunpack.i.h.bf16 %v1130_v8  ;;  %v1131_v11 = vunpack.i.l.bf16 %v1130_v8  ;;  %v1137_v15 = vunpack.i.h.bf16 %v1135_v9  ;;  %v1136_v17 = vunpack.i.l.bf16 %v1135_v9 }
 0x2b1   : > { %v578_v18 = vsel %vm575_vm9, %v1137_v15, %v1131_v11  ;;  %v576_v19 = vsel %vm575_vm9, %v1136_v17, %v1126_v6  ;;  %v579_v21 = vsel %vm575_vm9, %v1131_v11, %v1132_v10 }
 0x2b2   : > { %v1014_v22 = vpack.c.bf16 %v578_v18, %v576_v19  ;;  %v572_v23 = vpop.permute.xlu1 %571  ;;  %v574_v24 = vpop.permute.xlu0 %573  ;;  %v1012_v25 = vpack.c.bf16 %v579_v21, %v577_v20 }
 0x2b3   : > { %v581_v26 = vsel %vm575_vm9, %v572_v23, %v574_v24 }
 0x2b4   : > { %1013 = vmatprep.subr.bf16.mxu0 %v1012_v25 }
 0x2b5   : > { %1015 = vmatpush1.bf16.msra.mxu0 %v1014_v22 }
 0x2b6   : > { %v570_v27 = vpop.permute.xlu1 %569  ;;  %596 = vmatprep.subr.mxu0 %v581_v26 }
 0x2b7   : > { %v580_v28 = vsel %vm575_vm9, %v570_v27, %v572_v23 }
 0x2b9   : > { %597 = vmatpush1.msra.mxu0 %v580_v28 }
 0x2ba   : > { %971 = vmatmul.mubr.msk.f32.vlgmr.msra.gmra.mrb[2].mxu0 %vm588_vm10, %v550_v29 }
 0x2bb   : > { %770 = vmatprep.mubr.f32.mxu0 %v1311_v1 }
 0x2c3   : > { %v555_v32 = vpop.permute.xlu0 %554 }
 0x2c7   : > { %v676_v43 = vpop.permute.xlu1 %675  ;;  %v681_v44 = vpop.permute.xlu0 %680 }
 0x2cb   : > { %v686_v52 = vpop.permute.xlu1 %685  ;;  %v691_v6 = vpop.permute.xlu0 %690 }
 0x38d   : > { %v658_v33 = vpop.f32.mrb[2].mxu0 }
 0x38e   : > { %v659_v34 = vadd.f32 %v658_v33, %v555_v32  ;;  %v660_v35 = vpop.f32.mrb[3].mxu0 }
 0x38f   : > { %v661_v36 = vadd.f32 %v660_v35, %v555_v32 }
 0x390   : > { %v663_v38 = vmax.f32 %v659_v34, 0.0 }
 0x391   : > { %v664_v37 = vmax.f32 %v661_v36, 0.0 }
 0x393   : > { %706 = vmatprep.subr.mxu0 %v664_v37  ;;  %1016 = vmatprep.subr.mxu1 %v664_v37 }
 0x394   : > { %707 = vmatpush1.msra.mxu0 %v663_v38  ;;  %1017 = vmatpush1.msra.mxu1 %v663_v38 }
 0x395   : > { %973 = vmatmul.mubr.msk.f32.vlgmr.msra.gmra.mrb[2].mxu1 %vm693_vm11, %v666_v39  ;;  %972 = vmatmul.mubr.msk.f32.vlgmr.msra.gmra.mrb[4].mxu0 %vm693_vm11, %v665_v40 }
 0x396   : > { %782 = vmatprep.mubr.f32.mxu1 %v1311_v1 }
 0x399   : > { %974 = vmatmul.mubr.msk.f32.gmra.mrb[4].mxu1 %vm693_vm11, %v667_v41 }
 0x39a   : > { %788 = vmatprep.mubr.f32.mxu1 %v1311_v1 }
 0x39d   : > { %975 = vmatmul.mubr.msk.f32.gmra.mrb[6].mxu1 %vm693_vm11, %v668_v42 }
 0x468   : > { %v778_v45 = vpop.f32.mrb[2].mxu1  ;;  %v772_v46 = vpop.f32.mrb[4].mxu0 }
 0x469   : > { %v779_v47 = vadd.f32 %v778_v45, %v681_v44  ;;  %v780_v48 = vpop.f32.mrb[3].mxu1  ;;  %v773_v49 = vadd.f32 %v772_v46, %v676_v43  ;;  %v774_v50 = vpop.f32.mrb[5].mxu0 }
 0x46a   : > { %v781_v51 = vadd.f32 %v780_v48, %v681_v44  ;;  %v775_v53 = vadd.f32 %v774_v50, %v676_v43 }
 0x46b   : > { %v797_v1 = vmax.f32 %v779_v47, 0.0  ;;  %v795_v54 = vmax.f32 %v773_v49, 0.0 }
 0x46c   : > { %v798_v55 = vmax.f32 %v781_v51, 0.0  ;;  %v784_v56 = vpop.f32.mrb[4].mxu1  ;;  %v796_v57 = vmax.f32 %v775_v53, 0.0 }
 0x46d   : > { %v805_v58 = vadd.f32 %v797_v1, %v1562_v7  ;;  %v785_v59 = vadd.f32 %v784_v56, %v686_v52  ;;  %v803_v60 = vadd.f32 %v795_v54, %v1557_v5  ;;  %v786_v61 = vpop.f32.mrb[5].mxu1 }
 0x46e   : > { %v806_v62 = vadd.f32 %v798_v55, %v1554_v4  ;;  %v787_v63 = vadd.f32 %v786_v61, %v686_v52  ;;  %v804_v0 = vadd.f32 %v796_v57, %v1551_v3 }
 0x46f   : > { %813 = vst [vmem:[%s331_s0 + $0x10] sm:$0xff] %v805_v58  ;;  %v799_v2 = vmax.f32 %v785_v59, 0.0  ;;  %811 = vst [vmem:[%s331_s0] sm:$0xff] %v803_v60 }
 0x470   : > { %814 = vst [vmem:[%s331_s0 + $0x18] sm:$0xff] %v806_v62  ;;  %v800_v8 = vmax.f32 %v787_v63, 0.0  ;;  %812 = vst [vmem:[%s331_s0 + $0x8] sm:$0xff] %v804_v0  ;;  %v790_v7 = vpop.f32.mrb[6].mxu1 }
 0x471   : > { %v807_v5 = vadd.f32 %v799_v2, %v1573_v14  ;;  %v791_v9 = vadd.f32 %v790_v7, %v691_v6  ;;  %v792_v4 = vpop.f32.mrb[7].mxu1 }
 0x472   : > { %v808_v10 = vadd.f32 %v800_v8, %v1567_v12  ;;  %v793_v3 = vadd.f32 %v792_v4, %v691_v6 }
 0x473   : > { %815 = vst [vmem:[%s331_s0 + $0x20] sm:$0xff] %v807_v5  ;;  %v801_v11 = vmax.f32 %v791_v9, 0.0 }
 0x474   : > { %816 = vst [vmem:[%s331_s0 + $0x28] sm:$0xff] %v808_v10  ;;  %v802_v15 = vmax.f32 %v793_v3, 0.0 }
 0x475   : > { %v809_v17 = vadd.f32 %v801_v11, %v1578_v16 }
 0x476   : > { %v810_v12 = vadd.f32 %v802_v15, %v1570_v13 }
 0x477   : > { %817 = vst [vmem:[%s331_s0 + $0x30] sm:$0xff] %v809_v17 }
 0x478   : > { %818 = vst [vmem:[%s331_s0 + $0x38] sm:$0xff] %v810_v12 }
 0x479   : > { %1212 = shalt.err (!%p1209_p12)
}
 0x47a   : > { %s1213_s21 = scalar_lea.hbm %s1646_s15, 1024  ;;  %s1217_s10 = scalar_lea.hbm %s1737_s14, 4096 }
 0x47b   : > { %p1214_p5 = scmp.ne.s32.totalorder %s1646_s15, %s1213_s21  ;;  %p1218_p4 = scmp.lt.u32.totalorder %s1646_s15, %s1737_s14 }
 0x47c   : > { %p1219_p6 = scmp.lt.u32.totalorder %s1217_s10, %s1213_s21  ;;  %p1221_p0 = scmp.lt.u32.totalorder %s1213_s21, %s1646_s15 }
 0x47d   : > { %p1215_p11 = pnand %p1214_p5, %p1738_p3 }
 0x47e   : > { %p1220_p8 = por %p1219_p6, %p1218_p4 }
 0x47f   : > { %p1216_p2 = pneg %p1215_p11 }
 0x480   : > { %p1222_p1 = por %p1221_p0, %p1220_p8 }
 0x482   : > { %p1223_p13 = pnand %p1222_p1, %p1216_p2 }
 0x484   : > { %1226 = shalt.err (!%p1223_p13)
}
 0x485   : > { %s1319_s19 = smov 256   ;;  %s1320_s0 = smov 512  }
 0x486   : > { %s1321_s13 = smov 16  }
 0x487   : > { %1022 = dma.vmem_to_hbm [thread:$0]  (%p1738_p3), %s1640_s24, 1024, %s1646_s15, %s820_s7, %s1319_s19, %s1320_s0, %s1321_s13  }
 0x488 PF: > { %s1739_s9 = sld [smem:[#allocation11_spill]]  ;;  %s1740_s17 = sld [smem:[#allocation16_spill]] }
 0x489   : > { %p1036_p7 = scmp.ge.s32.totalorder %s1301_s28, 2 }
 0x48e   : > { %s850_s12 = sand.u32 1, %s1739_s9   ;;  %p1741_p10 = scmp.ne.s32.totalorder %s1740_s17, 0 }
 0x48f   : > { %s851_s18 = scalar_lea.sflag [#allocation4], %s850_s12 }
 0x490   : > { %p1032_p9 = pnand %p1036_p7, %p1741_p10 }
 0x492   : > { %1268 = dma.done.wait (!%p1032_p9), %s851_s18, 1024  }
 0x493   : > { %1270 = vsyncadd (!%p1032_p9), %s851_s18, 4294966272  ;;  %s25_s28 = sadd.s32 1, %s1301_s28   ;;  %s1742_s20 = sld [smem:[#allocation12_spill]] }
 0x494   : > { %p22_p12 = scmp.ge.s32.totalorder %s25_s28, 6   ;;  %s1743_s23 = sld [smem:[#allocation17_spill]] }
 0x495   : > { %s1744_s16 = sld [smem:[#allocation13_spill]]  ;;  %s1745_s15 = sld [smem:[#allocation14_spill]] }
 0x496   : > { %s1746_s21 = smov %s1277_s22  ;;  %s1748_s24 = smov %s1293_s26 }
 0x497   : > { %s1749_s25 = smov %s1297_s27  ;;  %24 = sbr.rel (!%p22_p12) target bundleno = 12 (0xc), region = 102 }
 0x499   : > { %s1747_s22 = smov %s1742_s20 }
 0x49b   : > { %s1750_s26 = smov %s1744_s16  ;;  %s1751_s27 = smov %s1745_s15 }
 0x49e   :  { %856 = vsyncpa [#allocation3], 1 }
 0x49f   :  { %858 = vsyncpa [#allocation3 + $0x1], 1 }
 0x4a0   :  { %859 = vsyncpa [#allocation6], 1 }
 0x4a1   :  { %861 = vsyncpa [#allocation6 + $0x1], 1 }
 0x4a2   :  { %862 = vsyncpa [#allocation4], 1 }
 0x4a3   :  { %864 = vsyncpa [#allocation4 + $0x1], 1 }

</bundles_post_ra>
